<compile_context>
chip_gen: v6e
topology: v6e:2x2x1
jax: 0.10.0
libtpu: 0.0.40
codegen_flags: <defaults>
</compile_context>

<pallas_src>
import functools

import jax
import jax.numpy as jnp
from jax.experimental import pallas as pl
from jax.experimental.pallas import tpu as pltpu

_LANE = 128
_SUBLANE = 8


def _triplet_kernel(a_ref, p_ref, n_ref, out_ref, acc_ref, *,
                    margin, inv_norm, tb, steps, valid_rows, need_mask):
    """Grid = (core_split, batch_tiles_per_core).

    axis 0 ("parallel"): sharded across TensorCores (v7x megacore); each value
        owns its own VMEM accumulator sweep and its own partial-output block.
    axis 1 ("arbitrary"): sequential reduction over batch tiles.
    """
    s = pl.program_id(1)

    # (re)initialise the per-core vector accumulator at the start of each sweep
    @pl.when(s == 0)
    def _():
        acc_ref[...] = jnp.zeros_like(acc_ref)

    a = a_ref[...]
    p = p_ref[...]
    n = n_ref[...]
    if a.dtype != jnp.float32:       # bf16 (or other) inputs: upcast, math in f32
        a = a.astype(jnp.float32)
        p = p.astype(jnp.float32)
        n = n.astype(jnp.float32)

    # Fused squared-distance difference:
    #   dp - dn = sum((a-p)^2 - (a-n)^2, 1) = sum((n-p) * (2a - p - n), 1)
    # -> one cross-lane reduction instead of two, fewer VALU ops per element.
    delta = jnp.sum((n - p) * (2.0 * a - p - n), axis=1, keepdims=True)   # (tb, 1)
    losses = jnp.maximum(delta + jnp.float32(margin), 0.0)                # (tb, 1)

    if need_mask:
        # zero out padded / redundant rows (partial last tile, odd tile count)
        c = pl.program_id(0)
        start = (c * steps + s) * tb
        row_ids = start + jax.lax.broadcasted_iota(jnp.int32, losses.shape, 0)
        losses = jnp.where(row_ids < valid_rows, losses, 0.0)

    # pure VPU vector accumulate in VMEM; no per-step cross-sublane reduce,
    # no per-step SMEM read-modify-write.
    acc_ref[...] += losses

    @pl.when(s == pl.num_programs(1) - 1)
    def _():
        part = jnp.sum(acc_ref[...]) * jnp.float32(inv_norm)
        out_ref[...] = jnp.broadcast_to(part, out_ref.shape)


def _select_tiling(B, D, itemsize, block_b=None):
    """Pick the largest batch tile fitting the per-generation VMEM budget."""
    try:
        vmem_cap = int(pltpu.get_tpu_info().vmem_capacity_bytes)
    except Exception:
        vmem_cap = 64 * 1024 * 1024          # conservative: v7x per-core VMEM
    # keep headroom for compiler internals; cap around ~100 MiB on 128 MiB parts
    budget = min(int(vmem_cap * 0.70), 100 * 1024 * 1024)

    lane_d = max(_LANE, -(-D // _LANE) * _LANE)     # lane-padded feature width
    # per batch row: 3 inputs x 2 pipeline buffers + lane-padded f32 acc row
    per_row = 3 * 2 * lane_d * itemsize + _LANE * 4
    max_tb = max(_SUBLANE, (budget // per_row) // _SUBLANE * _SUBLANE)
    # TODO(synk): if a single 8-row tile of D features ever exceeds the budget
    # (huge D), the feature axis must also be tiled (two-stage reduction).
    # NOTE: for best VPU/vreg efficiency production D should be a multiple of 128.

    if block_b is not None:
        tb = int(block_b)
        assert tb == B or tb % _SUBLANE == 0, "block_b must be a multiple of 8 or == B"
    elif B % _SUBLANE == 0:
        tb = min(max_tb, B)
    elif B <= max_tb:
        tb = B                    # single full-array block is always legal
    else:
        tb = max_tb

    num_tiles = -(-B // tb)                    # cdiv
    n_split = 2 if num_tiles >= 2 else 1       # feed both TensorCores on v7x
    steps = -(-num_tiles // n_split)

    used = 3 * 2 * tb * lane_d * itemsize + tb * _LANE * 4 + n_split * 8 * _LANE * 4
    vmem_limit = int(min(vmem_cap, max(used + (4 << 20), 32 << 20)))
    return tb, num_tiles, n_split, steps, vmem_limit


def triplet_loss(anchor, positive, negative, *, margin=1.0,
                 size_average=True, block_b=None):
    """Pallas TripletLoss. anchor/positive/negative: (B, D). Returns a scalar:
    mean (size_average=True) or sum of relu(||a-p||^2 - ||a-n||^2 + margin)."""
    assert anchor.shape == positive.shape == negative.shape
    B, D = anchor.shape
    itemsize = jnp.dtype(anchor.dtype).itemsize
    tb, num_tiles, n_split, steps, vmem_limit = _select_tiling(B, D, itemsize, block_b)
    need_mask = (n_split * steps * tb) != B

    kernel = functools.partial(
        _triplet_kernel,
        margin=float(margin),
        inv_norm=(1.0 / B) if size_average else 1.0,
        tb=tb, steps=steps, valid_rows=B, need_mask=need_mask,
    )

    if n_split * steps > num_tiles:
        # clamp redundant trailing grid steps onto the last real tile; their
        # rows are zeroed by the in-kernel mask.
        def in_map(c, s):
            return (jnp.minimum(c * steps + s, num_tiles - 1), 0)
    else:
        def in_map(c, s):
            return (c * steps + s, 0)

    in_spec = pl.BlockSpec((tb, D), in_map)
    out_spec = pl.BlockSpec((1, 8, 128), lambda c, s: (c, 0, 0))

    out = pl.pallas_call(
        kernel,
        out_shape=jax.ShapeDtypeStruct((n_split, 8, 128), jnp.float32),
        grid_spec=pltpu.PrefetchScalarGridSpec(
            num_scalar_prefetch=0,
            grid=(n_split, steps),
            in_specs=[in_spec, in_spec, in_spec],
            out_specs=out_spec,
            scratch_shapes=[pltpu.VMEM((tb, 1), jnp.float32)],
        ),
        compiler_params=pltpu.CompilerParams(
            dimension_semantics=("parallel", "arbitrary"),
            vmem_limit_bytes=vmem_limit,
        ),
    )(anchor, positive, negative)

    # one tiny partial per core split; combine outside the kernel
    return jnp.sum(out[:, 0, 0])


def _reference(anchor, positive, negative, margin=1.0, size_average=True):
    dp = jnp.sum((anchor - positive) ** 2, axis=1)
    dn = jnp.sum((anchor - negative) ** 2, axis=1)
    losses = jax.nn.relu(dp - dn + margin)
    return jnp.mean(losses) if size_average else jnp.sum(losses)


if __name__ == "__main__":
    key = jax.random.PRNGKey(0)
    k1, k2, k3, k4, k5, k6 = jax.random.split(key, 6)

    B, D = 16, 32
    anchor = jax.random.normal(k1, (B, D), dtype=jnp.float32)
    positive = jax.random.normal(k2, (B, D), dtype=jnp.float32)
    negative = jax.random.normal(k3, (B, D), dtype=jnp.float32)

    # 1) mean reduction (default), auto-sized single tile
    loss = jax.block_until_ready(triplet_loss(anchor, positive, negative, margin=1.0))
    ref = _reference(anchor, positive, negative, margin=1.0, size_average=True)
    assert jnp.allclose(loss, ref, rtol=1e-4, atol=1e-3), (loss, ref)

    # 2) sum reduction
    loss_s = jax.block_until_ready(
        triplet_loss(anchor, positive, negative, margin=1.0, size_average=False))
    ref_s = _reference(anchor, positive, negative, margin=1.0, size_average=False)
    assert jnp.allclose(loss_s, ref_s, rtol=1e-4, atol=1e-3), (loss_s, ref_s)

    # 3) multi-tile path: ragged batch + forced small tile exercises the
    #    2-way core split, the partial final tile and in-kernel row masking
    B2 = 20
    a2 = jax.random.normal(k4, (B2, D), dtype=jnp.float32)
    p2 = jax.random.normal(k5, (B2, D), dtype=jnp.float32)
    n2 = jax.random.normal(k6, (B2, D), dtype=jnp.float32)
    loss2 = jax.block_until_ready(
        triplet_loss(a2, p2, n2, margin=0.5, size_average=True, block_b=8))
    ref2 = _reference(a2, p2, n2, margin=0.5, size_average=True)
    assert jnp.allclose(loss2, ref2, rtol=1e-4, atol=1e-3), (loss2, ref2)

    # 4) bf16 inputs (halves HBM read traffic; math still f32 in-kernel)
    a16, p16, n16 = (x.astype(jnp.bfloat16) for x in (anchor, positive, negative))
    loss16 = jax.block_until_ready(triplet_loss(a16, p16, n16, margin=1.0))
    ref16 = _reference(a16.astype(jnp.float32), p16.astype(jnp.float32),
                       n16.astype(jnp.float32), margin=1.0, size_average=True)
    assert jnp.allclose(loss16, ref16, rtol=1e-3, atol=1e-3), (loss16, ref16)

    print("KERNEL_OK")
</pallas_src>

<mosaic_0001>
module attributes {stable_mosaic.version = 11 : i64} {
  func.func @_triplet_kernel(%arg0: i32, %arg1: i32, %arg2: memref<16x32xf32, #tpu.memory_space<vmem>>, %arg3: memref<16x32xf32, #tpu.memory_space<vmem>>, %arg4: memref<16x32xf32, #tpu.memory_space<vmem>>, %arg5: memref<1x8x128xf32, #tpu.memory_space<vmem>>, %arg6: memref<16x1xf32, #tpu.memory_space<vmem>>) attributes {dimension_semantics = [#tpu.dimension_semantics<parallel>, #tpu.dimension_semantics<arbitrary>], iteration_bounds = array<i64: 1, 1>, scalar_prefetch = 0 : i64, scratch_operands = 1 : i64, tpu.core_type = #tpu.core_type<tc>, window_params = [{transform_indices = @transform_0, window_bounds = array<i64: 16, 32>}, {transform_indices = @transform_1, window_bounds = array<i64: 16, 32>}, {transform_indices = @transform_2, window_bounds = array<i64: 16, 32>}, {transform_indices = @transform_3, window_bounds = array<i64: 1, 8, 128>}]} {
    %c0_i32 = arith.constant 0 : i32
    %0 = arith.cmpi eq, %arg1, %c0_i32 : i32
    %1 = arith.extui %0 : i1 to i32
    %c0_i32_0 = arith.constant 0 : i32
    %2 = arith.cmpi ne, %1, %c0_i32_0 : i32
    scf.if %2 {
      %cst_15 = arith.constant 0.000000e+00 : f32
      %24 = vector.broadcast %cst_15 : f32 to vector<16x1xf32>
      %c0_16 = arith.constant 0 : index
      %c0_17 = arith.constant 0 : index
      %25 = vector.load %arg6[%c0_16, %c0_17] : memref<16x1xf32, #tpu.memory_space<vmem>>, vector<16x1xf32>
      tpu.vector_store %arg6[%c0_16, %c0_17], %24 {strides = array<i32>} : memref<16x1xf32, #tpu.memory_space<vmem>>, vector<16x1xf32>,
    } else {
    }
    %c0 = arith.constant 0 : index
    %c0_1 = arith.constant 0 : index
    %3 = vector.load %arg2[%c0, %c0_1] : memref<16x32xf32, #tpu.memory_space<vmem>>, vector<16x32xf32>
    %c0_2 = arith.constant 0 : index
    %c0_3 = arith.constant 0 : index
    %4 = vector.load %arg3[%c0_2, %c0_3] : memref<16x32xf32, #tpu.memory_space<vmem>>, vector<16x32xf32>
    %c0_4 = arith.constant 0 : index
    %c0_5 = arith.constant 0 : index
    %5 = vector.load %arg4[%c0_4, %c0_5] : memref<16x32xf32, #tpu.memory_space<vmem>>, vector<16x32xf32>
    %6 = arith.subf %5, %4 : vector<16x32xf32>
    %cst = arith.constant 2.000000e+00 : f32
    %7 = vector.broadcast %cst : f32 to vector<16x32xf32>
    %8 = arith.mulf %7, %3 : vector<16x32xf32>
    %9 = arith.subf %8, %4 : vector<16x32xf32>
    %10 = arith.subf %9, %5 : vector<16x32xf32>
    %11 = arith.mulf %6, %10 : vector<16x32xf32>
    %cst_6 = arith.constant dense<0.000000e+00> : vector<16xf32>
    %12 = vector.multi_reduction <add>, %11, %cst_6 [1] : vector<16x32xf32> to vector<16xf32>
    %13 = vector.shape_cast %12 : vector<16xf32> to vector<16x1xf32>
    %cst_7 = arith.constant 1.000000e+00 : f32
    %14 = vector.broadcast %cst_7 : f32 to vector<16x1xf32>
    %15 = arith.addf %13, %14 : vector<16x1xf32>
    %cst_8 = arith.constant 0.000000e+00 : f32
    %16 = vector.broadcast %cst_8 : f32 to vector<16x1xf32>
    %17 = arith.maximumf %15, %16 : vector<16x1xf32>
    %c0_9 = arith.constant 0 : index
    %c0_10 = arith.constant 0 : index
    %18 = vector.load %arg6[%c0_9, %c0_10] : memref<16x1xf32, #tpu.memory_space<vmem>>, vector<16x1xf32>
    %19 = arith.addf %18, %17 : vector<16x1xf32>
    %c0_11 = arith.constant 0 : index
    %c0_12 = arith.constant 0 : index
    %20 = vector.load %arg6[%c0_11, %c0_12] : memref<16x1xf32, #tpu.memory_space<vmem>>, vector<16x1xf32>
    tpu.vector_store %arg6[%c0_11, %c0_12], %19 {strides = array<i32>} : memref<16x1xf32, #tpu.memory_space<vmem>>, vector<16x1xf32>,
    %c0_i32_13 = arith.constant 0 : i32
    %21 = arith.cmpi eq, %arg1, %c0_i32_13 : i32
    %22 = arith.extui %21 : i1 to i32
    %c0_i32_14 = arith.constant 0 : i32
    %23 = arith.cmpi ne, %22, %c0_i32_14 : i32
    scf.if %23 {
      %c0_15 = arith.constant 0 : index
      %c0_16 = arith.constant 0 : index
      %24 = vector.load %arg6[%c0_15, %c0_16] : memref<16x1xf32, #tpu.memory_space<vmem>>, vector<16x1xf32>
      %25 = vector.shape_cast %24 : vector<16x1xf32> to vector<1x16x1xf32>
      %cst_17 = arith.constant dense<0.000000e+00> : vector<1xf32>
      %26 = vector.multi_reduction <add>, %25, %cst_17 [1, 2] : vector<1x16x1xf32> to vector<1xf32>
      %27 = vector.shape_cast %26 : vector<1xf32> to vector<1x1x1xf32>
      %28 = vector.extract %27[0, 0, 0] : f32 from vector<1x1x1xf32>
      %cst_18 = arith.constant 6.250000e-02 : f32
      %29 = arith.mulf %28, %cst_18 : f32
      %30 = vector.broadcast %29 : f32 to vector<1x8x128xf32>
      %c0_19 = arith.constant 0 : index
      %c0_20 = arith.constant 0 : index
      %c0_21 = arith.constant 0 : index
      %31 = vector.load %arg5[%c0_19, %c0_20, %c0_21] : memref<1x8x128xf32, #tpu.memory_space<vmem>>, vector<1x8x128xf32>
      tpu.vector_store %arg5[%c0_19, %c0_20, %c0_21], %30 {strides = array<i32>} : memref<1x8x128xf32, #tpu.memory_space<vmem>>, vector<1x8x128xf32>,
    } else {
    }
    return
  }
  func.func @transform_0(%arg0: i32, %arg1: i32) -> (i32, i32) {
    %c1_i32 = arith.constant 1 : i32
    %0 = arith.muli %arg0, %c1_i32 : i32
    %1 = arith.addi %0, %arg1 : i32
    %c0_i32 = arith.constant 0 : i32
    %c0_i32_0 = arith.constant 0 : i32
    return %1, %c0_i32 : i32, i32
  }
  func.func @transform_1(%arg0: i32, %arg1: i32) -> (i32, i32) {
    %c1_i32 = arith.constant 1 : i32
    %0 = arith.muli %arg0, %c1_i32 : i32
    %1 = arith.addi %0, %arg1 : i32
    %c0_i32 = arith.constant 0 : i32
    %c0_i32_0 = arith.constant 0 : i32
    return %1, %c0_i32 : i32, i32
  }
  func.func @transform_2(%arg0: i32, %arg1: i32) -> (i32, i32) {
    %c1_i32 = arith.constant 1 : i32
    %0 = arith.muli %arg0, %c1_i32 : i32
    %1 = arith.addi %0, %arg1 : i32
    %c0_i32 = arith.constant 0 : i32
    %c0_i32_0 = arith.constant 0 : i32
    return %1, %c0_i32 : i32, i32
  }
  func.func @transform_3(%arg0: i32, %arg1: i32) -> (i32, i32, i32) {
    %c0_i32 = arith.constant 0 : i32
    %c0_i32_0 = arith.constant 0 : i32
    %c0_i32_1 = arith.constant 0 : i32
    return %arg0, %c0_i32, %c0_i32_0 : i32, i32, i32
  }
}

</mosaic_0001>

<bundles_post_ra>
// kernel: tpu_custom_call.1
= control target key start
LH: loop header
LB: loop body
LE: loop exit
PB: predicated region body
PF: predicated region fallthrough
CT: control target
= control target key end

     0   :  { %8 = vsyncpa [#allocation4], 0  ;;  %s291_s0 = inlined_call_operand.hbm [shape: f32[16,32], index: 0, kind: input, shape index: {}]   ;;  %s292_s1 = inlined_call_operand.hbm [shape: f32[16,32], index: 1, kind: input, shape index: {}]   ;;  %s293_s2 = inlined_call_operand.hbm [shape: f32[16,32], index: 2, kind: input, shape index: {}]   ;;  %s294_s3 = inlined_call_operand.hbm [shape: f32[1,8,128], index: 3, kind: output, shape index: {}]  }
   0x1   :  { %9 = vsyncpa [#allocation7], 0 }
   0x2   :  { %10 = vsyncpa [#allocation5], 0  ;;  %s246_s12 = smov [#allocation6]   ;;  %s247_s14 = smov [#allocation3]  }
   0x3   :  { %s36_s13 = sshll.u32 %s246_s12, 4  ;;  %s20_s15 = sshll.u32 %s247_s14, 4  ;;  %s37_s13 = int_to_ptr.vmem [resolvable:$true] %s36_s13  ;;  %s21_s15 = int_to_ptr.vmem [resolvable:$true] %s20_s15 }
   0x4   :  { %s168_s16 = scalar_lea.vmem %s37_s13, 256  ;;  %p173_p1 = scmp.lt.s32.totalorder %s37_s13, %s37_s13 }
   0x5   :  { %p169_p0 = scmp.ne.s32.totalorder %s37_s13, %s168_s16  ;;  %p174_p2 = scmp.lt.s32.totalorder %s168_s16, %s168_s16 }
   0x7   :  { %p175_p3 = por %p174_p2, %p173_p1 }
   0x9   :  { %p176_p4 = pnand %p175_p3, %p169_p0 }
   0xb   :  { %179 = shalt.err (!%p176_p4)
}
   0xc   :  { %s248_s17 = smov 128   ;;  %s249_s18 = smov 8  }
   0xd   :  { %42 = dma.hbm_to_vmem [thread:$0]  %s292_s1, 256, %s37_s13, [#allocation7], %s248_s17, %s248_s17, %s249_s18  }
   0xe   :  { %s188_s21 = scalar_lea.vmem %s21_s15, 256  ;;  %p193_p6 = scmp.lt.s32.totalorder %s21_s15, %s21_s15 }
   0xf   :  { %p189_p5 = scmp.ne.s32.totalorder %s21_s15, %s188_s21  ;;  %p194_p7 = scmp.lt.s32.totalorder %s188_s21, %s188_s21 }
  0x11   :  { %p195_p8 = por %p194_p7, %p193_p6 }
  0x13   :  { %p196_p9 = pnand %p195_p8, %p189_p5 }
  0x15   :  { %199 = shalt.err (!%p196_p9)
}
  0x16   :  { %26 = dma.hbm_to_vmem [thread:$0]  %s291_s0, 256, %s21_s15, [#allocation4], %s248_s17, %s248_s17, %s249_s18  }
  0x17   :  { %s250_s24 = smov [#allocation8]  }
  0x18   :  { %s52_s25 = sshll.u32 %s250_s24, 4  ;;  %s53_s25 = int_to_ptr.vmem [resolvable:$true] %s52_s25 }
  0x19   :  { %s208_s26 = scalar_lea.vmem %s53_s25, 256  ;;  %p213_p11 = scmp.lt.s32.totalorder %s53_s25, %s53_s25 }
  0x1a   :  { %p209_p10 = scmp.ne.s32.totalorder %s53_s25, %s208_s26  ;;  %p214_p12 = scmp.lt.s32.totalorder %s208_s26, %s208_s26 }
  0x1c   :  { %p215_p13 = por %p214_p12, %p213_p11 }
  0x1e   :  { %p216_p0 = pnand %p215_p13, %p209_p10 }
  0x20   :  { %219 = shalt.err (!%p216_p0)
}
  0x21   :  { %58 = dma.hbm_to_vmem [thread:$0]  %s293_s2, 256, %s53_s25, [#allocation7], %s248_s17, %s248_s17, %s249_s18  }
  0x22   :  { %240 = dma.done.wait [#allocation4], 256  }
  0x23   :  { %241 = vsyncadd [#allocation4], 4294967040 }
  0x24   :  { %242 = dma.done.wait [#allocation7], 512  }
  0x25   :  { %243 = vsyncadd [#allocation7], 4294966784  ;;  %vm78_vm0 = vcmask 7168   ;;  %v251_v0 = vmov 0.0   ;;  %v81_v1 = vld [vmem:[#allocation3] sm:$0xff]  ;;  %v83_v2 = vld [vmem:[#allocation6] sm:$0xff] }
  0x26   :  { %79 = vst.msk [vmem:[#allocation2] sm:$0xff] %vm78_vm0, %v251_v0  ;;  %80 = vst.msk [vmem:[#allocation2 + $0x8] sm:$0xff] %vm78_vm0, %v251_v0  ;;  %v85_v3 = vld [vmem:[#allocation8] sm:$0xff]  ;;  %v89_v4 = vmul.f32 2.0, %v81_v1  ;;  %v82_v5 = vld [vmem:[#allocation3 + $0x8] sm:$0xff]  ;;  %vm97_vm1 = vcmask 261120  }
  0x27   :  { %v84_v6 = vld [vmem:[#allocation6 + $0x8] sm:$0xff]  ;;  %v86_v7 = vld [vmem:[#allocation8 + $0x8] sm:$0xff]  ;;  %v90_v8 = vmul.f32 2.0, %v82_v5  ;;  %v87_v9 = vsub.f32 %v85_v3, %v83_v2  ;;  %s252_s0 = smov [#allocation9]  }
  0x28   :  { %v91_v10 = vsub.f32 %v89_v4, %v83_v2  ;;  %v88_v11 = vsub.f32 %v86_v7, %v84_v6  ;;  %s141_s2 = sshll.u32 %s252_s0, 4  ;;  %s142_s2 = int_to_ptr.vmem [resolvable:$true] %s141_s2 }
  0x29   :  { %v92_v12 = vsub.f32 %v90_v8, %v84_v6  ;;  %s220_s30 = scalar_lea.vmem %s142_s2, 128  ;;  %p225_p2 = scmp.lt.s32.totalorder %s142_s2, %s142_s2 }
  0x2a   :  { %v93_v13 = vsub.f32 %v91_v10, %v85_v3  ;;  %p221_p1 = scmp.ne.s32.totalorder %s142_s2, %s220_s30  ;;  %p226_p3 = scmp.lt.s32.totalorder %s220_s30, %s220_s30 }
  0x2b   :  { %v94_v14 = vsub.f32 %v92_v12, %v86_v7 }
  0x2c   :  { %v95_v15 = vmul.f32 %v93_v13, %v87_v9  ;;  %p227_p4 = por %p226_p3, %p225_p2 }
  0x2d   :  { %v96_v16 = vmul.f32 %v94_v14, %v88_v11  ;;  %v108_v21 = vld [vmem:[#allocation2] sm:$0xff]  ;;  %v109_v26 = vld [vmem:[#allocation2 + $0x8] sm:$0xff] }
  0x2e   :  { %v98_v17 = vsel %vm97_vm1, %v95_v15, 0.0  ;;  %p228_p5 = pnand %p227_p4, %p221_p1 }
  0x2f   :  { %99 = vadd.xlane.f32.xlu0 %v98_v17  ;;  %v101_v18 = vsel %vm97_vm1, %v96_v16, 0.0 }
  0x33   :  { %102 = vadd.xlane.f32.xlu0 %v101_v18 }
  0xb8   :  { %v100_v19 = vpop.xlane.xlu0 %99 }
  0xb9   :  { %v104_v20 = vadd.f32 1.0, %v100_v19 }
  0xbb   :  { %v106_v22 = vmax.f32 %v104_v20, 0.0 }
  0xbc   :  { %v103_v23 = vpop.xlane.xlu0 %102 }
  0xbd   :  { %v110_v24 = vadd.f32 %v108_v21, %v106_v22  ;;  %v105_v25 = vadd.f32 1.0, %v103_v23 }
  0xbf   :  { %113 = vst.msk [vmem:[#allocation2] sm:$0xff] %vm78_vm0, %v110_v24  ;;  %v107_v27 = vmax.f32 %v105_v25, 0.0 }
  0xc1   :  { %v111_v28 = vadd.f32 %v109_v26, %v107_v27 }
  0xc3   :  { %114 = vst.msk [vmem:[#allocation2 + $0x8] sm:$0xff] %vm78_vm0, %v111_v28 }
  0xc6   :  { %v118_v29 = vld [vmem:[#allocation2] sm:$0xff] }
  0xc7   :  { %v120_v31 = vsel %vm78_vm0, %v118_v29, 0.0 }
  0xca   :  { %v119_v30 = vld [vmem:[#allocation2 + $0x8] sm:$0xff] }
  0xcb   :  { %v121_v32 = vsel %vm78_vm0, %v119_v30, 0.0 }
  0xcc   :  { %v122_v33 = vadd.f32 %v121_v32, %v120_v31 }
  0xce   :  { %123 = vadd.xlane.f32.xlu1 %v122_v33 }
 0x157   :  { %v124_v34 = vpop.xlane.xlu1 %123 }
 0x158   :  { %v125_v35 = vrot.slane %v124_v34, 4 }
 0x15a   :  { %v126_v36 = vadd.f32 %v125_v35, %v124_v34 }
 0x15c   :  { %v127_v37 = vrot.slane %v126_v36, 2 }
 0x15e   :  { %v128_v38 = vadd.f32 %v127_v37, %v126_v36 }
 0x160   :  { %v129_v39 = vrot.slane %v128_v38, 1 }
 0x162   :  { %v130_v40 = vadd.f32 %v129_v39, %v128_v38 }
 0x164   :  { %151 = vpush %v130_v40 }
 0x195   :  { %s152_s28 = spop %151 }
 0x196   :  { %s132_s29 = smul.f32 0.0625, %s152_s28 }
 0x198   :  { %v133_v41 = vstv %s132_s29 }
 0x199   :  { %134 = vst [vmem:[#allocation9] sm:$0xff] %v133_v41 }
 0x19a   :  { %231 = shalt.err (!%p228_p5)
}
 0x19b   :  { %144 = dma.vmem_to_hbm [thread:$0]  %s142_s2, 128, %s294_s3, [#allocation5]  }
 0x19c   :  { %244 = dma.done.wait [#allocation5], 128  }
 0x19d   :  { %245 = vsyncadd [#allocation5], 4294967168 }
 0x19e   :  { %148 = vsyncpa [#allocation4], 1 }
 0x19f   :  { %149 = vsyncpa [#allocation7], 1 }
 0x1a0   :  { %150 = vsyncpa [#allocation5], 1 }

</bundles_post_ra>
